<compile_context>
chip_gen: v7x
topology: tpu7x:2x2x1
jax: 0.10.0
libtpu: 0.0.40
codegen_flags: <defaults>
</compile_context>

<pallas_src>
import jax
import jax.numpy as jnp
from jax.experimental import pallas as pl
from jax.experimental.pallas import tpu as pltpu


# ------------------------------- helpers -----------------------------------

def _is_pow2(n: int) -> bool:
    return n > 0 and (n & (n - 1)) == 0


_MATMUL_BLOCK_BYTES = 4 * 1024 * 1024   # target input-block size (matmul path)
_STRIDED_BLOCK_BYTES = 2 * 1024 * 1024  # target input-block size (strided path)
_VMEM_LIMIT_BYTES = 32 * 1024 * 1024    # safe on v5e / v6e / v7x


def _pool_matrix(W: int, dtype) -> jax.Array:
    """(2W, W//2) matrix P with P[2v,v]=P[2v+1,v]=P[W+2v,v]=P[W+2v+1,v]=0.25."""
    Wh = W // 2
    cols = jnp.arange(W) // 2                                   # (W,)
    half = jnp.where(cols[:, None] == jnp.arange(Wh)[None, :],
                     0.25, 0.0).astype(dtype)                   # (W, Wh)
    return jnp.concatenate([half, half], axis=0)                # (2W, Wh)


def _pick_rows(total_rows: int, row_bytes: int, target_bytes: int) -> int:
    """Rows per block: ~target_bytes, multiple of 8 (or the full extent)."""
    tm = max(1, target_bytes // max(1, row_bytes))
    if tm >= total_rows:
        return total_rows
    tm = max(8, (tm // 8) * 8)
    return min(tm, total_rows)


# ------------------------------- kernels ------------------------------------

def _avgpool_matmul_kernel(x_ref, p_ref, o_ref):
    # x_ref: (tm, 2W) rows = [row 2h | row 2h+1] of one plane.
    # p_ref: (2W, W//2) constant pooling matrix (resident in VMEM).
    # Whole 2x2 average pool as a single MXU contraction, f32 accumulation.
    o_ref[...] = jnp.dot(
        x_ref[...], p_ref[...], preferred_element_type=jnp.float32
    ).astype(o_ref.dtype)


def _avgpool_strided_kernel(x_ref, o_ref):
    # x_ref: (B, H, W), o_ref: (B, H//2, W//2).
    # Sublane (H) reduction first, then lane (W) reduction; accumulate in f32.
    x = x_ref[...]
    hs = x[:, 0::2, :].astype(jnp.float32) + x[:, 1::2, :].astype(jnp.float32)
    pooled = (hs[:, :, 0::2] + hs[:, :, 1::2]) * 0.25
    o_ref[...] = pooled.astype(o_ref.dtype)


# ------------------------------- wrapper -------------------------------------

def trivial_downsample(x: jax.Array) -> jax.Array:
    """avg_pool2d(x, kernel=2, stride=2) for NCHW input with pow-2 spatial dims."""
    N, C, H, W = x.shape
    if not (_is_pow2(H) and _is_pow2(W)) or H < 2 or W < 2:
        raise RuntimeError(f"Trying to downsample feature map of size {x.shape}")

    Hh, Wh = H // 2, W // 2
    isz = jnp.dtype(x.dtype).itemsize
    n_out = N * C * Hh * Wh
    cost = pl.CostEstimate(
        flops=4 * n_out,                                   # 3 adds + 1 mul / out
        transcendentals=0,
        bytes_accessed=int(N * C * H * W * isz * 1.25),    # read + 1/4 write
    )
    cparams = pltpu.CompilerParams(
        dimension_semantics=("parallel",),
        vmem_limit_bytes=_VMEM_LIMIT_BYTES,
    )

    if W < 256:
        # --- MXU matmul path (small/medium W) ---
        M = N * C * Hh
        x2 = x.reshape(M, 2 * W)                 # free row-major reshape
        P = _pool_matrix(W, x.dtype)
        tm = _pick_rows(M, 2 * W * isz, _MATMUL_BLOCK_BYTES)
        out2 = pl.pallas_call(
            _avgpool_matmul_kernel,
            out_shape=jax.ShapeDtypeStruct((M, Wh), x.dtype),
            grid_spec=pltpu.PrefetchScalarGridSpec(
                num_scalar_prefetch=0,
                grid=(pl.cdiv(M, tm),),
                in_specs=[
                    pl.BlockSpec((tm, 2 * W), lambda i: (i, 0)),
                    pl.BlockSpec((2 * W, Wh), lambda i: (0, 0)),  # resident
                ],
                out_specs=pl.BlockSpec((tm, Wh), lambda i: (i, 0)),
            ),
            compiler_params=cparams,
            cost_estimate=cost,
        )(x2, P)
        return out2.reshape(N, C, Hh, Wh)

    # --- strided path (wide maps: output already lane-dense, Wh >= 128) ---
    n_planes = N * C
    x3 = x.reshape(n_planes, H, W)
    plane_bytes = H * W * isz
    bsz = max(1, min(n_planes, _STRIDED_BLOCK_BYTES // plane_bytes))
    out3 = pl.pallas_call(
        _avgpool_strided_kernel,
        out_shape=jax.ShapeDtypeStruct((n_planes, Hh, Wh), x.dtype),
        grid_spec=pltpu.PrefetchScalarGridSpec(
            num_scalar_prefetch=0,
            grid=(pl.cdiv(n_planes, bsz),),
            in_specs=[pl.BlockSpec((bsz, H, W), lambda i: (i, 0, 0))],
            out_specs=pl.BlockSpec((bsz, Hh, Wh), lambda i: (i, 0, 0)),
        ),
        compiler_params=cparams,
        cost_estimate=cost,
    )(x3)
    return out3.reshape(N, C, Hh, Wh)


# --------------------------------- test --------------------------------------

if __name__ == "__main__":
    key = jax.random.PRNGKey(0)

    # Primary test: small spatial map (exercises the MXU-matmul path).
    x = jax.random.normal(key, (2, 4, 16, 16), dtype=jnp.float32)
    out = trivial_downsample(x)
    jax.block_until_ready(out)
    ref = x.reshape(2, 4, 8, 2, 8, 2).mean(axis=(3, 5))
    assert out.shape == (2, 4, 8, 8), out.shape
    assert jnp.allclose(out, ref, atol=1e-6, rtol=1e-6), "mismatch (matmul path)"

    # Secondary test: wide map (exercises the strided, lane-dense path).
    x_wide = jax.random.normal(key, (1, 2, 8, 256), dtype=jnp.float32)
    out_wide = trivial_downsample(x_wide)
    jax.block_until_ready(out_wide)
    ref_wide = x_wide.reshape(1, 2, 4, 2, 128, 2).mean(axis=(3, 5))
    assert out_wide.shape == (1, 2, 4, 128), out_wide.shape
    assert jnp.allclose(out_wide, ref_wide, atol=1e-6, rtol=1e-6), "mismatch (strided path)"

    print("KERNEL_OK")
</pallas_src>

<mosaic_0001>
module attributes {stable_mosaic.version = 11 : i64} {
  func.func @_avgpool_matmul_kernel(%arg0: i32, %arg1: memref<64x32xf32, #tpu.memory_space<vmem>>, %arg2: memref<32x8xf32, #tpu.memory_space<vmem>>, %arg3: memref<64x8xf32, #tpu.memory_space<vmem>>) attributes {dimension_semantics = [#tpu.dimension_semantics<parallel>], iteration_bounds = array<i64: 1>, scalar_prefetch = 0 : i64, scratch_operands = 0 : i64, tpu.core_type = #tpu.core_type<tc>, window_params = [{transform_indices = @transform_0, window_bounds = array<i64: 64, 32>}, {pipeline_mode = #tpu.pipeline_mode<synchronous>, transform_indices = @transform_1, window_bounds = array<i64: 32, 8>}, {transform_indices = @transform_2, window_bounds = array<i64: 64, 8>}]} {
    %c0 = arith.constant 0 : index
    %c0_0 = arith.constant 0 : index
    %0 = vector.load %arg1[%c0, %c0_0] : memref<64x32xf32, #tpu.memory_space<vmem>>, vector<64x32xf32>
    %c0_1 = arith.constant 0 : index
    %c0_2 = arith.constant 0 : index
    %1 = vector.load %arg2[%c0_1, %c0_2] : memref<32x8xf32, #tpu.memory_space<vmem>>, vector<32x8xf32>
    %cst = arith.constant dense<0.000000e+00> : vector<64x8xf32>
    %2 = tpu.matmul %0, %1, %cst {dimension_numbers = #tpu.dot_dimension_numbers<[1], [0], [0], [1], [0, 0, 1, 1], [], []>} : vector<64x32xf32>, vector<32x8xf32>, vector<64x8xf32> -> vector<64x8xf32>
    %c0_3 = arith.constant 0 : index
    %c0_4 = arith.constant 0 : index
    %3 = vector.load %arg3[%c0_3, %c0_4] : memref<64x8xf32, #tpu.memory_space<vmem>>, vector<64x8xf32>
    tpu.vector_store %arg3[%c0_3, %c0_4], %2 {strides = array<i32>} : memref<64x8xf32, #tpu.memory_space<vmem>>, vector<64x8xf32>,
    return
  }
  func.func @transform_0(%arg0: i32) -> (i32, i32) {
    %c0_i32 = arith.constant 0 : i32
    %c0_i32_0 = arith.constant 0 : i32
    return %arg0, %c0_i32 : i32, i32
  }
  func.func @transform_1(%arg0: i32) -> (i32, i32) {
    %c0_i32 = arith.constant 0 : i32
    %c0_i32_0 = arith.constant 0 : i32
    %c0_i32_1 = arith.constant 0 : i32
    return %c0_i32, %c0_i32_0 : i32, i32
  }
  func.func @transform_2(%arg0: i32) -> (i32, i32) {
    %c0_i32 = arith.constant 0 : i32
    %c0_i32_0 = arith.constant 0 : i32
    return %arg0, %c0_i32 : i32, i32
  }
}

</mosaic_0001>

<bundles_post_ra>
// kernel: tpu_custom_call.1
= control target key start
LH: loop header
LB: loop body
LE: loop exit
PB: predicated region body
PF: predicated region fallthrough
CT: control target
= control target key end

     0   :  { %vm23_vm0 = vcmask 261120   ;;  %vm153_vm1 = vcmask 64512   ;;  %s309_s1 = inlined_call_operand.vmem [shape: f32[32,8], index: 1, kind: input, shape index: {}]   ;;  %s310_s0 = inlined_call_operand.vmem [shape: f32[64,32], index: 0, kind: input, shape index: {}]   ;;  %s311_s2 = inlined_call_operand.vmem [shape: f32[64,8], index: 2, kind: output, shape index: {}]  }
   0x1   :  { %v19_v0 = vld [vmem:[%s309_s1] sm:$0xff]  ;;  %v20_v1 = vld [vmem:[%s309_s1 + $0x8] sm:$0xff]  ;;  %v21_v2 = vld [vmem:[%s309_s1 + $0x10] sm:$0xff] }
   0x2   :  { %v206_v3 = vpack.c.bf16 %v20_v1, %v19_v0  ;;  %v22_v4 = vld [vmem:[%s309_s1 + $0x18] sm:$0xff]  ;;  %v11_v5 = vld [vmem:[%s310_s0] sm:$0xff]  ;;  %v12_v8 = vld [vmem:[%s310_s0 + $0x8] sm:$0xff] }
   0x3   :  { %v15_v6 = vld [vmem:[%s310_s0 + $0x20] sm:$0xff]  ;;  %v210_v7 = vpack.c.bf16 %v22_v4, %v21_v2  ;;  %194 = vmatprep.mubr.msk.f32.mxu0 %vm23_vm0, %v11_v5  ;;  %v16_v9 = vld [vmem:[%s310_s0 + $0x28] sm:$0xff]  ;;  %v13_v10 = vld [vmem:[%s310_s0 + $0x10] sm:$0xff] }
   0x4   :  { %200 = vmatprep.mubr.msk.f32.mxu1 %vm23_vm0, %v15_v6  ;;  %207 = vmatprep.subr.bf16.mxu0 %v206_v3  ;;  %v17_v11 = vld [vmem:[%s310_s0 + $0x30] sm:$0xff]  ;;  %v14_v12 = vld [vmem:[%s310_s0 + $0x18] sm:$0xff] }
   0x5   :  { %214 = vmatprep.subr.bf16.mxu1 %v206_v3  ;;  %209 = vmatpush3.bf16.msra.mxu0 %v206_v3  ;;  %v18_v13 = vld [vmem:[%s310_s0 + $0x38] sm:$0xff] }
   0x6   :  { %216 = vmatpush3.bf16.msra.mxu1 %v206_v3  ;;  %211 = vmatprep.subr.bf16.mxu0 %v210_v7 }
   0x7   :  { %215 = vmatprep.subr.bf16.mxu1 %v210_v7 }
   0x9   :  { %213 = vmatpush3.bf16.msra.mxu0 %v210_v7 }
   0xa   :  { %217 = vmatpush3.bf16.msra.mxu1 %v210_v7 }
   0xc   :  { %195 = vmatmul.mubr.msk.f32.vlgmr.msra.gmra.mrb[0].mxu0 %vm23_vm0, %v12_v8 }
   0xd   :  { %201 = vmatmul.mubr.msk.f32.vlgmr.msra.gmra.mrb[0].mxu1 %vm23_vm0, %v16_v9  ;;  %197 = vmatprep.mubr.msk.f32.mxu0 %vm23_vm0, %v13_v10 }
   0xe   :  { %203 = vmatprep.mubr.msk.f32.mxu1 %vm23_vm0, %v17_v11 }
  0x10   :  { %198 = vmatmul.mubr.msk.f32.gmra.mrb[2].mxu0 %vm23_vm0, %v14_v12 }
  0x11   :  { %204 = vmatmul.mubr.msk.f32.gmra.mrb[2].mxu1 %vm23_vm0, %v18_v13 }
  0xdf   :  { %v196_v14 = vpop.f32.mrb[0].mxu0 }
  0xe0   :  { %v202_v15 = vpop.f32.mrb[0].mxu1  ;;  %155 = vst.msk [vmem:[%s311_s2 + $0x8] sm:$0xff] %vm153_vm1, %v196_v14  ;;  %v114_v16 = vpop.f32.mrb[1].mxu0 }
  0xe1   :  { %159 = vst.msk [vmem:[%s311_s2 + $0x28] sm:$0xff] %vm153_vm1, %v202_v15  ;;  %v134_v17 = vpop.f32.mrb[1].mxu1  ;;  %154 = vst.msk [vmem:[%s311_s2] sm:$0xff] %vm153_vm1, %v114_v16 }
  0xe2   :  { %158 = vst.msk [vmem:[%s311_s2 + $0x20] sm:$0xff] %vm153_vm1, %v134_v17 }
  0xe3   :  { %v199_v18 = vpop.f32.mrb[2].mxu0 }
  0xe4   :  { %v205_v19 = vpop.f32.mrb[2].mxu1  ;;  %157 = vst.msk [vmem:[%s311_s2 + $0x18] sm:$0xff] %vm153_vm1, %v199_v18  ;;  %v124_v20 = vpop.f32.mrb[3].mxu0 }
  0xe5   :  { %161 = vst.msk [vmem:[%s311_s2 + $0x38] sm:$0xff] %vm153_vm1, %v205_v19  ;;  %v144_v21 = vpop.f32.mrb[3].mxu1  ;;  %156 = vst.msk [vmem:[%s311_s2 + $0x10] sm:$0xff] %vm153_vm1, %v124_v20 }
  0xe6   :  { %160 = vst.msk [vmem:[%s311_s2 + $0x30] sm:$0xff] %vm153_vm1, %v144_v21 }

</bundles_post_ra>
